<compile_context>
chip_gen: v7x
topology: tpu7x:2x2x1
jax: 0.10.0
libtpu: 0.0.40
codegen_flags: <defaults>
</compile_context>

<pallas_src>
import jax
import jax.numpy as jnp
from jax.experimental import pallas as pl
from jax.experimental.pallas import tpu as pltpu

N_STEPS = 1000
X_DIM = 4
Y_DIM = 1
HIDDEN = 128
CAT_X = True
CAT_Y_PRED = True
DATA_DIM = Y_DIM + (X_DIM if CAT_X else 0) + (Y_DIM if CAT_Y_PRED else 0)  # 6


def _round_up(n, m):
    return ((n + m - 1) // m) * m


def _softplus(x):
    # matches torch.nn.functional.softplus(beta=1, threshold=20)
    return jnp.where(x > 20.0, x, jnp.log(1.0 + jnp.exp(jnp.minimum(x, 20.0))))


def _mlp_kernel(x_ref, g1_ref, g2_ref, g3_ref,
                w1_ref, b1_ref, w2_ref, b2_ref, w3_ref, b3_ref,
                w4_ref, b4_ref, o_ref):
    def cond_layer(h, w_ref, b_ref, g_ref):
        # MXU matmul with f32 accumulation
        pre = jnp.dot(h, w_ref[...], preferred_element_type=jnp.float32) + b_ref[...]
        # gamma scale + softplus in f32 (no bf16 VPU/EUP on v5e)
        return _softplus(g_ref[...].astype(jnp.float32) * pre)

    # Layer 1: K = 6 is tiny -> keep it f32 for accuracy (negligible MXU cost).
    h = cond_layer(x_ref[...], w1_ref, b1_ref, g1_ref)
    # Layers 2-3: bf16 MXU matmuls, f32 accumulation.
    h = cond_layer(h.astype(jnp.bfloat16), w2_ref, b2_ref, g2_ref)
    h = cond_layer(h.astype(jnp.bfloat16), w3_ref, b3_ref, g3_ref)

    # Final Linear(128, 1): VPU multiply + lane reduce (avoids an N=1 MXU pass).
    w4_row = w4_ref[...].astype(jnp.float32)                       # (1, HIDDEN)
    o = jnp.sum(h * w4_row, axis=-1, keepdims=True) + b4_ref[0]    # (tile, 1)
    o_ref[...] = o.astype(o_ref.dtype)


def init_params(key):
    """Deterministic synthetic parameters with the same shapes as the PyTorch module."""
    ks = jax.random.split(key, 12)

    def linear(kw, kb, n_in, n_out):
        bound = 1.0 / jnp.sqrt(jnp.float32(n_in))
        w = jax.random.uniform(kw, (n_in, n_out), jnp.float32, -bound, bound)
        b = jax.random.uniform(kb, (1, n_out), jnp.float32, -bound, bound)
        return w, b

    w1, b1 = linear(ks[0], ks[1], DATA_DIM, HIDDEN)
    w2, b2 = linear(ks[2], ks[3], HIDDEN, HIDDEN)
    w3, b3 = linear(ks[4], ks[5], HIDDEN, HIDDEN)
    w4, b4 = linear(ks[6], ks[7], HIDDEN, 1)
    # nn.Embedding(n_steps, 128).weight.data.uniform_()  -> U[0, 1)
    emb1 = jax.random.uniform(ks[8], (N_STEPS, HIDDEN), jnp.float32)
    emb2 = jax.random.uniform(ks[9], (N_STEPS, HIDDEN), jnp.float32)
    emb3 = jax.random.uniform(ks[10], (N_STEPS, HIDDEN), jnp.float32)
    return dict(w1=w1, b1=b1, w2=w2, b2=b2, w3=w3, b3=b3, w4=w4, b4=b4,
                emb1=emb1, emb2=emb2, emb3=emb3)


def conditional_guided_forward(params, x, y_t, y_0_hat, t, *, tile_b=512):
    # ---- glue: concat (f32, tiny) + timestep-embedding gather streamed as bf16 ----
    eps_in = jnp.concatenate([y_t, y_0_hat, x], axis=1).astype(jnp.float32)    # [B, 6]
    g1 = jnp.take(params["emb1"], t, axis=0).astype(jnp.bfloat16)              # [B, 128]
    g2 = jnp.take(params["emb2"], t, axis=0).astype(jnp.bfloat16)
    g3 = jnp.take(params["emb3"], t, axis=0).astype(jnp.bfloat16)
    # TODO(synk): optionally keep the 1000x128 embedding tables resident in VMEM and
    # gather in-kernel (would cut HBM stream ~40x, profile the gather lowering first);
    # wrapper-side take + bf16 stream is the safe 80%.

    # layer-1 weight stays f32 (tiny, resident); hidden weights in bf16 for the MXU
    w1 = params["w1"].astype(jnp.float32)
    w2 = params["w2"].astype(jnp.bfloat16)
    w3 = params["w3"].astype(jnp.bfloat16)
    w4_row = params["w4"].reshape(1, HIDDEN).astype(jnp.bfloat16)              # (1, 128)
    b1, b2, b3 = params["b1"], params["b2"], params["b3"]                      # (1, 128) f32
    b4 = params["b4"].reshape(1).astype(jnp.float32)                           # SMEM scalar

    # ---- batch tiling: big tiles, arbitrary B via padding, >=2 steps for v7x ----
    B = eps_in.shape[0]
    tile = min(tile_b, _round_up(B, 8))            # never exceed (sublane-padded) batch
    if B > tile_b:
        # large batch: keep at least 2 grid steps so the "parallel" axis can be
        # sharded across v7x's two TensorCores
        tile = min(tile, _round_up(pl.cdiv(B, 2), 8))
    grid_b = pl.cdiv(B, tile)
    b_pad = grid_b * tile
    if b_pad != B:
        pad = ((0, b_pad - B), (0, 0))
        eps_in = jnp.pad(eps_in, pad)
        g1 = jnp.pad(g1, pad)
        g2 = jnp.pad(g2, pad)
        g3 = jnp.pad(g3, pad)

    row = lambda i: (i, 0)    # activations: tile over the batch axis
    full = lambda i: (0, 0)   # weights: same (resident) block every grid step

    out = pl.pallas_call(
        _mlp_kernel,
        out_shape=jax.ShapeDtypeStruct((b_pad, 1), jnp.float32),
        grid=(grid_b,),
        in_specs=[
            pl.BlockSpec((tile, DATA_DIM), row),     # eps_in (f32)
            pl.BlockSpec((tile, HIDDEN), row),       # gamma1 = emb1[t] (bf16)
            pl.BlockSpec((tile, HIDDEN), row),       # gamma2
            pl.BlockSpec((tile, HIDDEN), row),       # gamma3
            pl.BlockSpec((DATA_DIM, HIDDEN), full),  # w1 (f32)
            pl.BlockSpec((1, HIDDEN), full),         # b1 (f32)
            pl.BlockSpec((HIDDEN, HIDDEN), full),    # w2 (bf16)
            pl.BlockSpec((1, HIDDEN), full),         # b2
            pl.BlockSpec((HIDDEN, HIDDEN), full),    # w3 (bf16)
            pl.BlockSpec((1, HIDDEN), full),         # b3
            pl.BlockSpec((1, HIDDEN), full),         # w4 as a (1,128) row (bf16)
            pl.BlockSpec(memory_space=pltpu.MemorySpace.SMEM),  # b4 scalar
        ],
        out_specs=pl.BlockSpec((tile, 1), row),
        compiler_params=pltpu.CompilerParams(dimension_semantics=("parallel",)),
    )(eps_in, g1, g2, g3, w1, b1, w2, b2, w3, b3, w4_row, b4)

    return out[:B]


def _reference_forward(params, x, y_t, y_0_hat, t):
    """Pure-JAX f32 reference mirroring the PyTorch forward."""
    eps = jnp.concatenate([y_t, y_0_hat, x], axis=1).astype(jnp.float32)
    h = _softplus(params["emb1"][t] * (eps @ params["w1"] + params["b1"]))
    h = _softplus(params["emb2"][t] * (h @ params["w2"] + params["b2"]))
    h = _softplus(params["emb3"][t] * (h @ params["w3"] + params["b3"]))
    return h @ params["w4"] + params["b4"]


if __name__ == "__main__":
    key = jax.random.PRNGKey(0)
    k_p, k_x, k_yt, k_y0, k_t = jax.random.split(key, 5)

    # small, non-multiple-of-8 batch to exercise the padding path
    B = 20
    params = init_params(k_p)
    x = jax.random.normal(k_x, (B, X_DIM), jnp.float32)
    y_0_hat = jax.random.normal(k_y0, (B, Y_DIM), jnp.float32)
    y_t = y_0_hat + jax.random.normal(k_yt, (B, Y_DIM), jnp.float32)   # y_t = y_0_hat + z
    t = jax.random.randint(k_t, (B,), 0, N_STEPS, jnp.int32)

    ref = _reference_forward(params, x, y_t, y_0_hat, t)

    # default (single big tile) and a small forced tile (multi-step grid + padding)
    for tb in (512, 8):
        out = conditional_guided_forward(params, x, y_t, y_0_hat, t, tile_b=tb)
        out = jax.block_until_ready(out)
        assert out.shape == (B, 1)
        # bf16 gamma/weight/activation streams -> compare against the f32 reference
        # with a bf16-appropriate tolerance
        assert jnp.allclose(out, ref, atol=5e-2, rtol=5e-2), (
            f"Pallas output mismatch vs reference (tile_b={tb})")

    print("KERNEL_OK")
</pallas_src>

<mosaic_0001>
module attributes {stable_mosaic.version = 11 : i64} {
  func.func @_mlp_kernel(%arg0: i32, %arg1: memref<24x6xf32, #tpu.memory_space<vmem>>, %arg2: memref<24x128xbf16, #tpu.memory_space<vmem>>, %arg3: memref<24x128xbf16, #tpu.memory_space<vmem>>, %arg4: memref<24x128xbf16, #tpu.memory_space<vmem>>, %arg5: memref<6x128xf32, #tpu.memory_space<vmem>>, %arg6: memref<1x128xf32, #tpu.memory_space<vmem>>, %arg7: memref<128x128xbf16, #tpu.memory_space<vmem>>, %arg8: memref<1x128xf32, #tpu.memory_space<vmem>>, %arg9: memref<128x128xbf16, #tpu.memory_space<vmem>>, %arg10: memref<1x128xf32, #tpu.memory_space<vmem>>, %arg11: memref<1x128xbf16, #tpu.memory_space<vmem>>, %arg12: memref<1xf32, #tpu.memory_space<smem>>, %arg13: memref<24x1xf32, #tpu.memory_space<vmem>>) attributes {dimension_semantics = [#tpu.dimension_semantics<parallel>], iteration_bounds = array<i64: 1>, scalar_prefetch = 0 : i64, scratch_operands = 0 : i64, tpu.core_type = #tpu.core_type<tc>, window_params = [{transform_indices = @transform_0, window_bounds = array<i64: 24, 6>}, {transform_indices = @transform_1, window_bounds = array<i64: 24, 128>}, {transform_indices = @transform_2, window_bounds = array<i64: 24, 128>}, {transform_indices = @transform_3, window_bounds = array<i64: 24, 128>}, {pipeline_mode = #tpu.pipeline_mode<synchronous>, transform_indices = @transform_4, window_bounds = array<i64: 6, 128>}, {pipeline_mode = #tpu.pipeline_mode<synchronous>, transform_indices = @transform_5, window_bounds = array<i64: 1, 128>}, {pipeline_mode = #tpu.pipeline_mode<synchronous>, transform_indices = @transform_6, window_bounds = array<i64: 128, 128>}, {pipeline_mode = #tpu.pipeline_mode<synchronous>, transform_indices = @transform_7, window_bounds = array<i64: 1, 128>}, {pipeline_mode = #tpu.pipeline_mode<synchronous>, transform_indices = @transform_8, window_bounds = array<i64: 128, 128>}, {pipeline_mode = #tpu.pipeline_mode<synchronous>, transform_indices = @transform_9, window_bounds = array<i64: 1, 128>}, {pipeline_mode = #tpu.pipeline_mode<synchronous>, transform_indices = @transform_10, window_bounds = array<i64: 1, 128>}, {transform_indices = @transform_11, window_bounds = array<i64: 1>}, {transform_indices = @transform_12, window_bounds = array<i64: 24, 1>}]} {
    %c0 = arith.constant 0 : index
    %c0_0 = arith.constant 0 : index
    %0 = vector.load %arg1[%c0, %c0_0] : memref<24x6xf32, #tpu.memory_space<vmem>>, vector<24x6xf32>
    %c0_1 = arith.constant 0 : index
    %c0_2 = arith.constant 0 : index
    %1 = vector.load %arg5[%c0_1, %c0_2] : memref<6x128xf32, #tpu.memory_space<vmem>>, vector<6x128xf32>
    %cst = arith.constant dense<0.000000e+00> : vector<24x128xf32>
    %2 = tpu.matmul %0, %1, %cst {dimension_numbers = #tpu.dot_dimension_numbers<[1], [0], [0], [1], [0, 0, 1, 1], [], []>} : vector<24x6xf32>, vector<6x128xf32>, vector<24x128xf32> -> vector<24x128xf32>
    %c0_3 = arith.constant 0 : index
    %c0_4 = arith.constant 0 : index
    %3 = vector.load %arg6[%c0_3, %c0_4] : memref<1x128xf32, #tpu.memory_space<vmem>>, vector<1x128xf32>
    %4 = vector.broadcast %3 : vector<1x128xf32> to vector<24x128xf32>
    %5 = arith.addf %2, %4 : vector<24x128xf32>
    %c0_5 = arith.constant 0 : index
    %c0_6 = arith.constant 0 : index
    %6 = vector.load %arg2[%c0_5, %c0_6] : memref<24x128xbf16, #tpu.memory_space<vmem>>, vector<24x128xbf16>
    %7 = arith.extf %6 : vector<24x128xbf16> to vector<24x128xf32>
    %8 = arith.mulf %7, %5 : vector<24x128xf32>
    %cst_7 = arith.constant 2.000000e+01 : f32
    %9 = vector.broadcast %cst_7 : f32 to vector<24x128xf32>
    %10 = arith.cmpf ogt, %8, %9 : vector<24x128xf32>
    %cst_8 = arith.constant 2.000000e+01 : f32
    %11 = vector.broadcast %cst_8 : f32 to vector<24x128xf32>
    %12 = arith.minimumf %8, %11 : vector<24x128xf32>
    %13 = math.exp %12 : vector<24x128xf32>
    %cst_9 = arith.constant 1.000000e+00 : f32
    %14 = vector.broadcast %cst_9 : f32 to vector<24x128xf32>
    %15 = arith.addf %14, %13 : vector<24x128xf32>
    %16 = math.log %15 : vector<24x128xf32>
    %17 = arith.select %10, %8, %16 : vector<24x128xi1>, vector<24x128xf32>
    %18 = arith.truncf %17 : vector<24x128xf32> to vector<24x128xbf16>
    %c0_10 = arith.constant 0 : index
    %c0_11 = arith.constant 0 : index
    %19 = vector.load %arg7[%c0_10, %c0_11] : memref<128x128xbf16, #tpu.memory_space<vmem>>, vector<128x128xbf16>
    %cst_12 = arith.constant dense<0.000000e+00> : vector<24x128xf32>
    %20 = tpu.matmul %18, %19, %cst_12 {dimension_numbers = #tpu.dot_dimension_numbers<[1], [0], [0], [1], [0, 0, 1, 1], [], []>} : vector<24x128xbf16>, vector<128x128xbf16>, vector<24x128xf32> -> vector<24x128xf32>
    %c0_13 = arith.constant 0 : index
    %c0_14 = arith.constant 0 : index
    %21 = vector.load %arg8[%c0_13, %c0_14] : memref<1x128xf32, #tpu.memory_space<vmem>>, vector<1x128xf32>
    %22 = vector.broadcast %21 : vector<1x128xf32> to vector<24x128xf32>
    %23 = arith.addf %20, %22 : vector<24x128xf32>
    %c0_15 = arith.constant 0 : index
    %c0_16 = arith.constant 0 : index
    %24 = vector.load %arg3[%c0_15, %c0_16] : memref<24x128xbf16, #tpu.memory_space<vmem>>, vector<24x128xbf16>
    %25 = arith.extf %24 : vector<24x128xbf16> to vector<24x128xf32>
    %26 = arith.mulf %25, %23 : vector<24x128xf32>
    %cst_17 = arith.constant 2.000000e+01 : f32
    %27 = vector.broadcast %cst_17 : f32 to vector<24x128xf32>
    %28 = arith.cmpf ogt, %26, %27 : vector<24x128xf32>
    %cst_18 = arith.constant 2.000000e+01 : f32
    %29 = vector.broadcast %cst_18 : f32 to vector<24x128xf32>
    %30 = arith.minimumf %26, %29 : vector<24x128xf32>
    %31 = math.exp %30 : vector<24x128xf32>
    %cst_19 = arith.constant 1.000000e+00 : f32
    %32 = vector.broadcast %cst_19 : f32 to vector<24x128xf32>
    %33 = arith.addf %32, %31 : vector<24x128xf32>
    %34 = math.log %33 : vector<24x128xf32>
    %35 = arith.select %28, %26, %34 : vector<24x128xi1>, vector<24x128xf32>
    %36 = arith.truncf %35 : vector<24x128xf32> to vector<24x128xbf16>
    %c0_20 = arith.constant 0 : index
    %c0_21 = arith.constant 0 : index
    %37 = vector.load %arg9[%c0_20, %c0_21] : memref<128x128xbf16, #tpu.memory_space<vmem>>, vector<128x128xbf16>
    %cst_22 = arith.constant dense<0.000000e+00> : vector<24x128xf32>
    %38 = tpu.matmul %36, %37, %cst_22 {dimension_numbers = #tpu.dot_dimension_numbers<[1], [0], [0], [1], [0, 0, 1, 1], [], []>} : vector<24x128xbf16>, vector<128x128xbf16>, vector<24x128xf32> -> vector<24x128xf32>
    %c0_23 = arith.constant 0 : index
    %c0_24 = arith.constant 0 : index
    %39 = vector.load %arg10[%c0_23, %c0_24] : memref<1x128xf32, #tpu.memory_space<vmem>>, vector<1x128xf32>
    %40 = vector.broadcast %39 : vector<1x128xf32> to vector<24x128xf32>
    %41 = arith.addf %38, %40 : vector<24x128xf32>
    %c0_25 = arith.constant 0 : index
    %c0_26 = arith.constant 0 : index
    %42 = vector.load %arg4[%c0_25, %c0_26] : memref<24x128xbf16, #tpu.memory_space<vmem>>, vector<24x128xbf16>
    %43 = arith.extf %42 : vector<24x128xbf16> to vector<24x128xf32>
    %44 = arith.mulf %43, %41 : vector<24x128xf32>
    %cst_27 = arith.constant 2.000000e+01 : f32
    %45 = vector.broadcast %cst_27 : f32 to vector<24x128xf32>
    %46 = arith.cmpf ogt, %44, %45 : vector<24x128xf32>
    %cst_28 = arith.constant 2.000000e+01 : f32
    %47 = vector.broadcast %cst_28 : f32 to vector<24x128xf32>
    %48 = arith.minimumf %44, %47 : vector<24x128xf32>
    %49 = math.exp %48 : vector<24x128xf32>
    %cst_29 = arith.constant 1.000000e+00 : f32
    %50 = vector.broadcast %cst_29 : f32 to vector<24x128xf32>
    %51 = arith.addf %50, %49 : vector<24x128xf32>
    %52 = math.log %51 : vector<24x128xf32>
    %53 = arith.select %46, %44, %52 : vector<24x128xi1>, vector<24x128xf32>
    %c0_30 = arith.constant 0 : index
    %c0_31 = arith.constant 0 : index
    %54 = vector.load %arg11[%c0_30, %c0_31] : memref<1x128xbf16, #tpu.memory_space<vmem>>, vector<1x128xbf16>
    %55 = arith.extf %54 : vector<1x128xbf16> to vector<1x128xf32>
    %56 = vector.broadcast %55 : vector<1x128xf32> to vector<24x128xf32>
    %57 = arith.mulf %53, %56 : vector<24x128xf32>
    %cst_32 = arith.constant dense<0.000000e+00> : vector<24xf32>
    %58 = vector.multi_reduction <add>, %57, %cst_32 [1] : vector<24x128xf32> to vector<24xf32>
    %59 = vector.shape_cast %58 : vector<24xf32> to vector<24x1xf32>
    %c0_33 = arith.constant 0 : index
    %60 = memref.load %arg12[%c0_33] : memref<1xf32, #tpu.memory_space<smem>>
    %61 = vector.broadcast %60 : f32 to vector<24x1xf32>
    %62 = arith.addf %59, %61 : vector<24x1xf32>
    %c0_34 = arith.constant 0 : index
    %c0_35 = arith.constant 0 : index
    %63 = vector.load %arg13[%c0_34, %c0_35] : memref<24x1xf32, #tpu.memory_space<vmem>>, vector<24x1xf32>
    tpu.vector_store %arg13[%c0_34, %c0_35], %62 {strides = array<i32>} : memref<24x1xf32, #tpu.memory_space<vmem>>, vector<24x1xf32>,
    return
  }
  func.func @transform_0(%arg0: i32) -> (i32, i32) {
    %c0_i32 = arith.constant 0 : i32
    %c0_i32_0 = arith.constant 0 : i32
    return %arg0, %c0_i32 : i32, i32
  }
  func.func @transform_1(%arg0: i32) -> (i32, i32) {
    %c0_i32 = arith.constant 0 : i32
    %c0_i32_0 = arith.constant 0 : i32
    return %arg0, %c0_i32 : i32, i32
  }
  func.func @transform_2(%arg0: i32) -> (i32, i32) {
    %c0_i32 = arith.constant 0 : i32
    %c0_i32_0 = arith.constant 0 : i32
    return %arg0, %c0_i32 : i32, i32
  }
  func.func @transform_3(%arg0: i32) -> (i32, i32) {
    %c0_i32 = arith.constant 0 : i32
    %c0_i32_0 = arith.constant 0 : i32
    return %arg0, %c0_i32 : i32, i32
  }
  func.func @transform_4(%arg0: i32) -> (i32, i32) {
    %c0_i32 = arith.constant 0 : i32
    %c0_i32_0 = arith.constant 0 : i32
    %c0_i32_1 = arith.constant 0 : i32
    return %c0_i32, %c0_i32_0 : i32, i32
  }
  func.func @transform_5(%arg0: i32) -> (i32, i32) {
    %c0_i32 = arith.constant 0 : i32
    %c0_i32_0 = arith.constant 0 : i32
    %c0_i32_1 = arith.constant 0 : i32
    return %c0_i32, %c0_i32_0 : i32, i32
  }
  func.func @transform_6(%arg0: i32) -> (i32, i32) {
    %c0_i32 = arith.constant 0 : i32
    %c0_i32_0 = arith.constant 0 : i32
    %c0_i32_1 = arith.constant 0 : i32
    return %c0_i32, %c0_i32_0 : i32, i32
  }
  func.func @transform_7(%arg0: i32) -> (i32, i32) {
    %c0_i32 = arith.constant 0 : i32
    %c0_i32_0 = arith.constant 0 : i32
    %c0_i32_1 = arith.constant 0 : i32
    return %c0_i32, %c0_i32_0 : i32, i32
  }
  func.func @transform_8(%arg0: i32) -> (i32, i32) {
    %c0_i32 = arith.constant 0 : i32
    %c0_i32_0 = arith.constant 0 : i32
    %c0_i32_1 = arith.constant 0 : i32
    return %c0_i32, %c0_i32_0 : i32, i32
  }
  func.func @transform_9(%arg0: i32) -> (i32, i32) {
    %c0_i32 = arith.constant 0 : i32
    %c0_i32_0 = arith.constant 0 : i32
    %c0_i32_1 = arith.constant 0 : i32
    return %c0_i32, %c0_i32_0 : i32, i32
  }
  func.func @transform_10(%arg0: i32) -> (i32, i32) {
    %c0_i32 = arith.constant 0 : i32
    %c0_i32_0 = arith.constant 0 : i32
    %c0_i32_1 = arith.constant 0 : i32
    return %c0_i32, %c0_i32_0 : i32, i32
  }
  func.func @transform_11(%arg0: i32) -> i32 {
    %c0_i32 = arith.constant 0 : i32
    %c0_i32_0 = arith.constant 0 : i32
    return %c0_i32 : i32
  }
  func.func @transform_12(%arg0: i32) -> (i32, i32) {
    %c0_i32 = arith.constant 0 : i32
    %c0_i32_0 = arith.constant 0 : i32
    return %arg0, %c0_i32 : i32, i32
  }
}

</mosaic_0001>

<bundles_post_ra>
// kernel: tpu_custom_call.1
= control target key start
LH: loop header
LB: loop body
LE: loop exit
PB: predicated region body
PF: predicated region fallthrough
CT: control target
= control target key end

     0   :  { %18 = vsyncpa [#allocation4], 0  ;;  %s1083_s0 = inlined_call_operand.vmem [shape: f32[24,6], index: 0, kind: input, shape index: {}]   ;;  %s1084_s1 = inlined_call_operand.hbm [shape: bf16[24,128], index: 1, kind: input, shape index: {}]   ;;  %s1085_s2 = inlined_call_operand.hbm [shape: bf16[24,128], index: 2, kind: input, shape index: {}]   ;;  %s1086_s3 = inlined_call_operand.hbm [shape: bf16[24,128], index: 3, kind: input, shape index: {}]   ;;  %s1087_s4 = inlined_call_operand.hbm [shape: f32[6,128], index: 4, kind: input, shape index: {}]   ;;  %s1088_s5 = inlined_call_operand.vmem [shape: f32[1,128], index: 5, kind: input, shape index: {}]   ;;  %s1089_s6 = inlined_call_operand.hbm [shape: bf16[128,128], index: 6, kind: input, shape index: {}]   ;;  %s1090_s7 = inlined_call_operand.vmem [shape: f32[1,128], index: 7, kind: input, shape index: {}]   ;;  %s1091_s8 = inlined_call_operand.vmem [shape: bf16[128,128], index: 8, kind: input, shape index: {}]   ;;  %s1092_s9 = inlined_call_operand.vmem [shape: f32[1,128], index: 9, kind: input, shape index: {}]   ;;  %s1093_s10 = inlined_call_operand.vmem [shape: bf16[1,128], index: 10, kind: input, shape index: {}]   ;;  %s1094_s11 = inlined_call_operand.<no memory space> [shape: f32[1], index: 11, kind: input, shape index: {}]   ;;  %s1095_s12 = inlined_call_operand.vmem [shape: f32[24,1], index: 12, kind: output, shape index: {}]  }
   0x1   :  { %19 = vsyncpa [#allocation6], 0 }
   0x2   :  { %20 = vsyncpa [#allocation9], 0  ;;  %s873_s21 = smov [#allocation5]   ;;  %s874_s23 = smov [#allocation8]  }
   0x3   :  { %s40_s22 = sshll.u32 %s873_s21, 4  ;;  %s65_s24 = sshll.u32 %s874_s23, 4  ;;  %s41_s22 = int_to_ptr.vmem [resolvable:$true] %s40_s22  ;;  %s66_s24 = int_to_ptr.vmem [resolvable:$true] %s65_s24 }
   0x4   :  { %s757_s27 = scalar_lea.hbm %s1085_s2, 192 }
   0x5   :  { %p758_p0 = scmp.ne.s32.totalorder %s1085_s2, %s757_s27  ;;  %p761_p1 = scmp.lt.u32.totalorder %s757_s27, %s1085_s2 }
   0x7   :  { %p763_p2 = pnand %p761_p1, %p758_p0 }
   0x9   :  { %766 = shalt.err (!%p763_p2)
}
   0xa   :  { %s767_s14 = scalar_lea.vmem %s41_s22, 192  ;;  %p772_p4 = scmp.lt.s32.totalorder %s41_s22, %s41_s22 }
   0xb   :  { %p768_p3 = scmp.ne.s32.totalorder %s41_s22, %s767_s14  ;;  %p773_p5 = scmp.lt.s32.totalorder %s767_s14, %s767_s14 }
   0xd   :  { %p774_p6 = por %p773_p5, %p772_p4 }
   0xf   :  { %p775_p7 = pnand %p774_p6, %p768_p3 }
  0x11   :  { %778 = shalt.err (!%p775_p7)
}
  0x12   :  { %s875_s15 = smov 64   ;;  %s876_s16 = smov 4  }
  0x13   :  { %46 = dma.hbm_to_vmem [thread:$0]  %s1085_s2, 192, %s41_s22, [#allocation6], %s875_s15, %s875_s15, %s876_s16  }
  0x14   :  { %s779_s21 = scalar_lea.hbm %s1087_s4, 128 }
  0x15   :  { %p780_p8 = scmp.ne.s32.totalorder %s1087_s4, %s779_s21  ;;  %p783_p9 = scmp.lt.u32.totalorder %s779_s21, %s1087_s4 }
  0x17   :  { %p785_p10 = pnand %p783_p9, %p780_p8 }
  0x19   :  { %788 = shalt.err (!%p785_p10)
}
  0x1a   :  { %s789_s28 = scalar_lea.vmem %s66_s24, 128  ;;  %p794_p12 = scmp.lt.s32.totalorder %s66_s24, %s66_s24 }
  0x1b   :  { %p790_p11 = scmp.ne.s32.totalorder %s66_s24, %s789_s28  ;;  %p795_p13 = scmp.lt.s32.totalorder %s789_s28, %s789_s28 }
  0x1d   :  { %p796_p0 = por %p795_p13, %p794_p12 }
  0x1f   :  { %p797_p1 = pnand %p796_p0, %p790_p11 }
  0x21   :  { %800 = shalt.err (!%p797_p1)
}
  0x22   :  { %68 = dma.hbm_to_vmem [thread:$0]  %s1087_s4, 128, %s66_s24, [#allocation9]  }
  0x23   :  { %s877_s29 = smov [#allocation3]   ;;  %s878_s13 = smov [#allocation7]  }
  0x24   :  { %s28_s30 = sshll.u32 %s877_s29, 4  ;;  %s52_s14 = sshll.u32 %s878_s13, 4  ;;  %s29_s30 = int_to_ptr.vmem [resolvable:$true] %s28_s30  ;;  %s974_s14 = int_to_ptr.vmem [resolvable:$true] %s52_s14 }
  0x25   :  { %s801_s19 = scalar_lea.hbm %s1084_s1, 192 }
  0x26   :  { %p802_p2 = scmp.ne.s32.totalorder %s1084_s1, %s801_s19  ;;  %p805_p3 = scmp.lt.u32.totalorder %s801_s19, %s1084_s1 }
  0x28   :  { %p807_p4 = pnand %p805_p3, %p802_p2 }
  0x2a   :  { %810 = shalt.err (!%p807_p4)
}
  0x2b   :  { %s811_s4 = scalar_lea.vmem %s29_s30, 192  ;;  %p816_p6 = scmp.lt.s32.totalorder %s29_s30, %s29_s30 }
  0x2c   :  { %p812_p5 = scmp.ne.s32.totalorder %s29_s30, %s811_s4  ;;  %p817_p7 = scmp.lt.s32.totalorder %s811_s4, %s811_s4 }
  0x2e   :  { %p818_p8 = por %p817_p7, %p816_p6 }
  0x30   :  { %p819_p9 = pnand %p818_p8, %p812_p5 }
  0x32   :  { %822 = shalt.err (!%p819_p9)
}
  0x33   :  { %34 = dma.hbm_to_vmem [thread:$0]  %s1084_s1, 192, %s29_s30, [#allocation4], %s875_s15, %s875_s15, %s876_s16  }
  0x34   :  { %s823_s2 = scalar_lea.hbm %s1086_s3, 192 }
  0x35   :  { %p824_p10 = scmp.ne.s32.totalorder %s1086_s3, %s823_s2  ;;  %p827_p11 = scmp.lt.u32.totalorder %s823_s2, %s1086_s3 }
  0x37   :  { %p829_p12 = pnand %p827_p11, %p824_p10 }
  0x39   :  { %832 = shalt.err (!%p829_p12)
}
  0x3a   :  { %s833_s18 = scalar_lea.vmem %s974_s14, 192  ;;  %p838_p0 = scmp.lt.s32.totalorder %s974_s14, %s974_s14 }
  0x3b   :  { %p834_p13 = scmp.ne.s32.totalorder %s974_s14, %s833_s18  ;;  %p839_p1 = scmp.lt.s32.totalorder %s833_s18, %s833_s18 }
  0x3d   :  { %p840_p2 = por %p839_p1, %p838_p0 }
  0x3f   :  { %p841_p3 = pnand %p840_p2, %p834_p13 }
  0x41   :  { %844 = shalt.err (!%p841_p3)
}
  0x42   :  { %58 = dma.hbm_to_vmem [thread:$0]  %s1086_s3, 192, %s974_s14, [#allocation6], %s875_s15, %s875_s15, %s876_s16  }
  0x43   :  { %s879_s19 = smov [#allocation10]   ;;  %s845_s25 = scalar_lea.hbm %s1089_s6, 1024 }
  0x44   :  { %s76_s20 = sshll.u32 %s879_s19, 4  ;;  %p846_p4 = scmp.ne.s32.totalorder %s1089_s6, %s845_s25  ;;  %s77_s20 = int_to_ptr.vmem [resolvable:$true] %s76_s20 }
  0x45   :  { %p849_p5 = scmp.lt.u32.totalorder %s845_s25, %s1089_s6 }
  0x47   :  { %p851_p6 = pnand %p849_p5, %p846_p4 }
  0x49   :  { %854 = shalt.err (!%p851_p6)
}
  0x4a   :  { %s855_s28 = scalar_lea.vmem %s77_s20, 1024  ;;  %p860_p8 = scmp.lt.s32.totalorder %s77_s20, %s77_s20 }
  0x4b   :  { %p856_p7 = scmp.ne.s32.totalorder %s77_s20, %s855_s28  ;;  %p861_p9 = scmp.lt.s32.totalorder %s855_s28, %s855_s28 }
  0x4d   :  { %p862_p10 = por %p861_p9, %p860_p8 }
  0x4f   :  { %p863_p11 = pnand %p862_p10, %p856_p7 }
  0x51   :  { %866 = shalt.err (!%p863_p11)
}
  0x52   :  { %82 = dma.hbm_to_vmem [thread:$0]  %s1089_s6, 1024, %s77_s20, [#allocation9], %s875_s15, %s875_s15, %s876_s16  }
  0x53   :  { %867 = dma.done.wait [#allocation4], 192  }
  0x54   :  { %868 = vsyncadd [#allocation4], 4294967104 }
  0x55   :  { %869 = dma.done.wait [#allocation6], 384  }
  0x56   :  { %870 = vsyncadd [#allocation6], 4294966912 }
  0x57   :  { %871 = dma.done.wait [#allocation9], 1152  }
  0x58   :  { %872 = vsyncadd [#allocation9], 4294966144  ;;  %v880_v0 = vmov 0.0   ;;  %vm881_vm0 = vmmov 0   ;;  %vm130_vm1 = vcmask 1045504   ;;  %vm120_vm2 = vcmask 48128  }
  0x59   :  { %645 = vmatprep.subr.mxu0 %v880_v0  ;;  %647 = vmatprep.mubr.msk.f32.mxu0 %vm881_vm0, %v880_v0  ;;  %v112_v1 = vld [vmem:[#allocation8] sm:$0x3f]  ;;  %v111_v4 = vld [vmem:[%s1083_s0 + $0x10] sm:$0xff]  ;;  %v707_v7 = vld [vmem:[#allocation10 + $0x10] sm:$0xff]   ;;  %vm575_vm12 = vcmask 7168  }
  0x5a   :  { %v109_v2 = vld [vmem:[%s1083_s0] sm:$0xff]  ;;  %646 = vmatpush3.msk.msra.mxu0 %vm130_vm1, %v112_v1  ;;  %v110_v3 = vld [vmem:[%s1083_s0 + $0x8] sm:$0xff]  ;;  %v706_v6 = vld [vmem:[#allocation10 + $0x8] sm:$0xff]  }
  0x5b   :  { %648 = vmatmul.mubr.msk.f32.vlgmr.msra.gmra.mrb[0].mxu0 %vm120_vm2, %v109_v2  ;;  %v705_v5 = vld [vmem:[#allocation10] sm:$0xff]   ;;  %v708_v8 = vld [vmem:[#allocation10 + $0x18] sm:$0xff]   ;;  %v710_v10 = vld [vmem:[#allocation10 + $0x28] sm:$0xff]  }
  0x5c   :  { %650 = vmatprep.mubr.msk.f32.mxu0 %vm881_vm0, %v880_v0  ;;  %656 = vmatprep.subr.bf16.mxu1 %v705_v5  ;;  %v709_v9 = vld [vmem:[#allocation10 + $0x20] sm:$0xff]   ;;  %v711_v11 = vld [vmem:[#allocation10 + $0x30] sm:$0xff]   ;;  %v712_v12 = vld [vmem:[#allocation10 + $0x38] sm:$0xff]  }
  0x5d   :  { %657 = vmatpush3.bf16.msra.mxu1 %v705_v5  ;;  %v610_v13 = vld [vmem:[#allocation3] sm:$0xff]   ;;  %v216_v22 = vld [vmem:[#allocation3 + $0x8] sm:$0xf]  ;;  %v715_v56 = vld [vmem:[%s1091_s8 + $0x10] sm:$0xff]  }
  0x5e   :  { %658 = vmatprep.subr.bf16.mxu1 %v706_v6  ;;  %v586_v14 = vld [vmem:[%s1088_s5] ss:$0 sm:$0xff]  ;;  %v611_v15 = vunpack.c.l.bf16 %v610_v13  ;;  %v612_v20 = vunpack.c.h.bf16 %v610_v13  ;;  %v219_v28 = vunpack.c.l.bf16 %v216_v22  ;;  %v714_v55 = vld [vmem:[%s1091_s8 + $0x8] sm:$0xff]   ;;  %v716_v57 = vld [vmem:[%s1091_s8 + $0x18] sm:$0xff]  }
  0x5f   :  { %651 = vmatmul.mubr.msk.f32.gmra.mrb[2].mxu0 %vm120_vm2, %v110_v3  ;;  %v713_v54 = vld [vmem:[%s1091_s8] sm:$0xff]   ;;  %v718_v59 = vld [vmem:[%s1091_s8 + $0x28] sm:$0xff]   ;;  %v719_v60 = vld [vmem:[%s1091_s8 + $0x30] sm:$0xff]  }
  0x60   :  { %653 = vmatprep.mubr.msk.f32.mxu0 %vm881_vm0, %v880_v0  ;;  %676 = vmatprep.subr.bf16.mxu0 %v713_v54  ;;  %v717_v58 = vld [vmem:[%s1091_s8 + $0x20] sm:$0xff]   ;;  %v720_v61 = vld [vmem:[%s1091_s8 + $0x38] sm:$0xff]   ;;  %v370_v62 = vld [vmem:[#allocation5 + $0x8] sm:$0xf] }
  0x61   :  { %659 = vmatpush3.bf16.msra.mxu1 %v706_v6  ;;  %677 = vmatpush3.bf16.msra.mxu0 %v713_v54  ;;  %v614_v63 = vld [vmem:[#allocation5] sm:$0xff]   ;;  %v591_v0 = vld [vmem:[%s1090_s7] ss:$0 sm:$0xff]  ;;  %v373_v1 = vunpack.c.l.bf16 %v370_v62  ;;  %v557_v62 = vlaneseq }
  0x62   :  { %660 = vmatprep.subr.bf16.mxu1 %v707_v7  ;;  %678 = vmatprep.subr.bf16.mxu0 %v714_v55  ;;  %v615_v3 = vunpack.c.l.bf16 %v614_v63 }
  0x63   :  { %654 = vmatmul.mubr.msk.f32.gmra.mrb[4].mxu0 %vm120_vm2, %v111_v4 }
  0x65   :  { %661 = vmatpush3.bf16.msra.mxu1 %v707_v7  ;;  %679 = vmatpush3.bf16.msra.mxu0 %v714_v55 }
  0x66   :  { %662 = vmatprep.subr.bf16.mxu1 %v708_v8  ;;  %680 = vmatprep.subr.bf16.mxu0 %v715_v56 }
  0x69   :  { %663 = vmatpush3.bf16.msra.mxu1 %v708_v8  ;;  %681 = vmatpush3.bf16.msra.mxu0 %v715_v56  ;;  %v616_v8 = vunpack.c.h.bf16 %v614_v63 }
  0x6a   :  { %664 = vmatprep.subr.bf16.mxu1 %v709_v9  ;;  %682 = vmatprep.subr.bf16.mxu0 %v716_v57 }
  0x6d   :  { %665 = vmatpush3.bf16.msra.mxu1 %v709_v9  ;;  %683 = vmatpush3.bf16.msra.mxu0 %v716_v57 }
  0x6e   :  { %666 = vmatprep.subr.bf16.mxu1 %v710_v10  ;;  %684 = vmatprep.subr.bf16.mxu0 %v717_v58 }
  0x71   :  { %667 = vmatpush3.bf16.msra.mxu1 %v710_v10  ;;  %685 = vmatpush3.bf16.msra.mxu0 %v717_v58 }
  0x72   :  { %668 = vmatprep.subr.bf16.mxu1 %v711_v11  ;;  %686 = vmatprep.subr.bf16.mxu0 %v718_v59 }
  0x75   :  { %669 = vmatpush3.bf16.msra.mxu1 %v711_v11  ;;  %687 = vmatpush3.bf16.msra.mxu0 %v718_v59 }
  0x76   :  { %670 = vmatprep.subr.bf16.mxu1 %v712_v12  ;;  %688 = vmatprep.subr.bf16.mxu0 %v719_v60 }
  0x79   :  { %671 = vmatpush3.bf16.msra.mxu1 %v712_v12  ;;  %689 = vmatpush3.bf16.msra.mxu0 %v719_v60 }
  0x7a   :  { %690 = vmatprep.subr.bf16.mxu0 %v720_v61 }
  0x7d   :  { %691 = vmatpush3.bf16.msra.mxu0 %v720_v61 }
 0x12e   :  { %v200_v16 = vpop.f32.mrb[0].mxu0 }
 0x12f   :  { %v201_v17 = vadd.f32 %v586_v14, %v200_v16  ;;  %v649_v18 = vpop.f32.mrb[1].mxu0 }
 0x131   :  { %v220_v19 = vmul.f32 %v611_v15, %v201_v17 }
 0x132   :  { %v205_v21 = vpop.f32.mrb[2].mxu0 }
 0x133   :  { %v226_v23 = vmin.f32 %v220_v19, 20.0  ;;  %v206_v24 = vadd.f32 %v586_v14, %v205_v21  ;;  %v652_v25 = vpop.f32.mrb[3].mxu0  ;;  %vm223_vm3 = vcmp.gt.f32.partialorder %v220_v19, 20.0 }
 0x135   :  { %v229_v26 = vmul.f32 1.442695, %v226_v23  ;;  %v221_v27 = vmul.f32 %v612_v20, %v206_v24 }
 0x136   :  { %v210_v29 = vpop.f32.mrb[4].mxu0 }
 0x137   :  { %721 = vpow2.f32 %v229_v26  ;;  %v227_v30 = vmin.f32 %v221_v27, 20.0  ;;  %v211_v31 = vadd.f32 %v586_v14, %v210_v29  ;;  %v655_v32 = vpop.f32.mrb[5].mxu0  ;;  %vm224_vm4 = vcmp.gt.f32.partialorder %v221_v27, 20.0 }
 0x139   :  { %v231_v33 = vmul.f32 1.442695, %v227_v30  ;;  %v222_v34 = vmul.f32 %v219_v28, %v211_v31 }
 0x13b   :  { %723 = vpow2.f32 %v231_v33  ;;  %v228_v35 = vmin.f32 %v222_v34, 20.0  ;;  %vm225_vm5 = vcmp.gt.f32.partialorder %v222_v34, 20.0 }
 0x13d   :  { %v233_v36 = vmul.f32 1.442695, %v228_v35 }
 0x13f   :  { %725 = vpow2.f32 %v233_v36 }
 0x141   :  { %v722_v37 = vpop.eup %721 }
 0x142   :  { %v235_v38 = vadd.f32 1.0, %v722_v37  ;;  %v524_v37 = vld [vmem:[#allocation7 + $0x8] sm:$0xf] }
 0x144   :  { %727 = vlog2.f32 %v235_v38  ;;  %v618_v38 = vld [vmem:[#allocation7] sm:$0xff]  }
 0x145   :  { %v724_v39 = vpop.eup %723 }
 0x146   :  { %v236_v40 = vadd.f32 1.0, %v724_v39  ;;  %v600_v39 = vld [vmem:[%s1092_s9] ss:$0 sm:$0xff] }
 0x148   :  { %729 = vlog2.f32 %v236_v40  ;;  %v527_v40 = vunpack.c.l.bf16 %v524_v37 }
 0x149   :  { %v726_v41 = vpop.eup %725 }
 0x14a   :  { %v237_v42 = vadd.f32 1.0, %v726_v41 }
 0x14c   :  { %731 = vlog2.f32 %v237_v42  ;;  %v619_v42 = vunpack.c.l.bf16 %v618_v38 }
 0x14e   :  { %v728_v43 = vpop.eup %727 }
 0x14f   :  { %v239_v44 = vmul.f32 0.6931472, %v728_v43 }
 0x151   :  { %v244_v47 = vsel %vm223_vm3, %v220_v19, %v239_v44 }
 0x152   :  { %v730_v45 = vpop.eup %729 }
 0x153   :  { %v241_v46 = vmul.f32 0.6931472, %v730_v45 }
 0x155   :  { %v245_v48 = vsel %vm224_vm4, %v221_v27, %v241_v46 }
 0x156   :  { %v732_v49 = vpop.eup %731  ;;  %v247_v50 = vpack.c.bf16 %v245_v48, %v244_v47  ;;  %v620_v47 = vunpack.c.h.bf16 %v618_v38 }
 0x157   :  { %v243_v51 = vmul.f32 0.6931472, %v732_v49 }
 0x158   :  { %672 = vmatprep.mubr.bf16.mxu1 %v247_v50 }
 0x159   :  { %v246_v52 = vsel %vm225_vm5, %v222_v34, %v243_v51 }
 0x15a   :  { %v248_v53 = vpack.c.bf16 %v246_v52, %v246_v52 }
 0x15c   :  { %673 = vmatmul.mubr.bf16.vlgmr.msra.gmra.mrb[0].mxu1 %v248_v53 }
 0x22f   :  { %v674_v2 = vpop.f32.mrb[0].mxu1 }
 0x230   :  { %v363_v4 = vadd.f32 %v674_v2, %v591_v0  ;;  %v354_v5 = vpop.f32.mrb[1].mxu1  ;;  %v558_v2 = vshrl.u32 %v557_v62, 7 }
 0x231   :  { %v355_v6 = vadd.f32 %v591_v0, %v354_v5  ;;  %v675_v7 = vpop.f32.mrb[2].mxu1 }
 0x232   :  { %v376_v9 = vmul.f32 %v373_v1, %v363_v4  ;;  %v357_v10 = vpop.f32.mrb[3].mxu1  ;;  %v559_v5 = vsub.s32 0, %v558_v2 }
 0x233   :  { %v374_v11 = vmul.f32 %v615_v3, %v355_v6  ;;  %v358_v12 = vadd.f32 %v591_v0, %v357_v10  ;;  %v555_v3 = vld [vmem:[%s1093_s10] sm:$0x1] }
 0x234   :  { %v382_v13 = vmin.f32 %v376_v9, 20.0  ;;  %vm379_vm6 = vcmp.gt.f32.partialorder %v376_v9, 20.0  ;;  %v556_v4 = vunpack.c.l.bf16 %v555_v3 }
 0x235   :  { %v380_v14 = vmin.f32 %v374_v11, 20.0  ;;  %v375_v15 = vmul.f32 %v616_v8, %v358_v12  ;;  %vm377_vm7 = vcmp.gt.f32.partialorder %v374_v11, 20.0 }
 0x236   :  { %v387_v16 = vmul.f32 1.442695, %v382_v13  ;;  %v560_v7 = vrot.slane %v556_v4, %v559_v5 }
 0x237   :  { %v383_v17 = vmul.f32 1.442695, %v380_v14  ;;  %v381_v18 = vmin.f32 %v375_v15, 20.0  ;;  %vm378_vm8 = vcmp.gt.f32.partialorder %v375_v15, 20.0 }
 0x238   :  { %733 = vpow2.f32 %v387_v16 }
 0x239   :  { %735 = vpow2.f32 %v383_v17  ;;  %v385_v19 = vmul.f32 1.442695, %v381_v18 }
 0x23b   :  { %737 = vpow2.f32 %v385_v19  ;;  %v571_v19 = vstv %s1094_s11 }
 0x242   :  { %v734_v20 = vpop.eup %733 }
 0x243   :  { %v736_v21 = vpop.eup %735  ;;  %v391_v22 = vadd.f32 1.0, %v734_v20 }
 0x244   :  { %v389_v23 = vadd.f32 1.0, %v736_v21 }
 0x245   :  { %v738_v24 = vpop.eup %737  ;;  %739 = vlog2.f32 %v391_v22 }
 0x246   :  { %741 = vlog2.f32 %v389_v23  ;;  %v390_v25 = vadd.f32 1.0, %v738_v24 }
 0x248   :  { %743 = vlog2.f32 %v390_v25 }
 0x24f   :  { %v740_v26 = vpop.eup %739 }
 0x250   :  { %v742_v27 = vpop.eup %741  ;;  %v397_v28 = vmul.f32 0.6931472, %v740_v26 }
 0x251   :  { %v393_v29 = vmul.f32 0.6931472, %v742_v27 }
 0x252   :  { %v744_v30 = vpop.eup %743  ;;  %v400_v32 = vsel %vm379_vm6, %v376_v9, %v397_v28 }
 0x253   :  { %v395_v31 = vmul.f32 0.6931472, %v744_v30  ;;  %v398_v33 = vsel %vm377_vm7, %v374_v11, %v393_v29  ;;  %v402_v36 = vpack.c.bf16 %v400_v32, %v400_v32 }
 0x255   :  { %v399_v34 = vsel %vm378_vm8, %v375_v15, %v395_v31 }
 0x256   :  { %v401_v35 = vpack.c.bf16 %v399_v34, %v398_v33 }
 0x258   :  { %692 = vmatprep.mubr.bf16.mxu0 %v401_v35 }
 0x259   :  { %693 = vmatmul.mubr.bf16.vlgmr.msra.gmra.mrb[8].mxu0 %v402_v36 }
 0x32c   :  { %v694_v41 = vpop.f32.mrb[8].mxu0 }
 0x32d   :  { %v517_v43 = vadd.f32 %v694_v41, %v600_v39  ;;  %v508_v44 = vpop.f32.mrb[9].mxu0 }
 0x32e   :  { %v509_v45 = vadd.f32 %v600_v39, %v508_v44  ;;  %v695_v46 = vpop.f32.mrb[10].mxu0 }
 0x32f   :  { %v530_v48 = vmul.f32 %v527_v40, %v517_v43  ;;  %v511_v49 = vpop.f32.mrb[11].mxu0 }
 0x330   :  { %v528_v50 = vmul.f32 %v619_v42, %v509_v45  ;;  %v512_v51 = vadd.f32 %v600_v39, %v511_v49 }
 0x331   :  { %v536_v52 = vmin.f32 %v530_v48, 20.0  ;;  %vm533_vm9 = vcmp.gt.f32.partialorder %v530_v48, 20.0 }
 0x332   :  { %v534_v53 = vmin.f32 %v528_v50, 20.0  ;;  %v529_v54 = vmul.f32 %v620_v47, %v512_v51  ;;  %vm531_vm10 = vcmp.gt.f32.partialorder %v528_v50, 20.0 }
 0x333   :  { %v541_v55 = vmul.f32 1.442695, %v536_v52 }
 0x334   :  { %v537_v56 = vmul.f32 1.442695, %v534_v53  ;;  %v535_v57 = vmin.f32 %v529_v54, 20.0  ;;  %vm532_vm11 = vcmp.gt.f32.partialorder %v529_v54, 20.0 }
 0x335   :  { %745 = vpow2.f32 %v541_v55 }
 0x336   :  { %747 = vpow2.f32 %v537_v56  ;;  %v539_v58 = vmul.f32 1.442695, %v535_v57 }
 0x338   :  { %749 = vpow2.f32 %v539_v58 }
 0x33f   :  { %v746_v59 = vpop.eup %745 }
 0x340   :  { %v748_v60 = vpop.eup %747  ;;  %v545_v61 = vadd.f32 1.0, %v746_v59 }
 0x341   :  { %v543_v63 = vadd.f32 1.0, %v748_v60 }
 0x342   :  { %v750_v0 = vpop.eup %749  ;;  %751 = vlog2.f32 %v545_v61 }
 0x343   :  { %753 = vlog2.f32 %v543_v63  ;;  %v544_v1 = vadd.f32 1.0, %v750_v0 }
 0x345   :  { %755 = vlog2.f32 %v544_v1 }
 0x34c   :  { %v752_v6 = vpop.eup %751 }
 0x34d   :  { %v754_v8 = vpop.eup %753  ;;  %v551_v9 = vmul.f32 0.6931472, %v752_v6 }
 0x34e   :  { %v547_v10 = vmul.f32 0.6931472, %v754_v8 }
 0x34f   :  { %v756_v11 = vpop.eup %755  ;;  %v554_v12 = vsel %vm533_vm9, %v530_v48, %v551_v9 }
 0x350   :  { %v563_v13 = vmul.f32 %v560_v7, %v554_v12  ;;  %v552_v14 = vsel %vm531_vm10, %v528_v50, %v547_v10  ;;  %v549_v15 = vmul.f32 0.6931472, %v756_v11 }
 0x351   :  { %v561_v16 = vmul.f32 %v560_v7, %v552_v14 }
 0x352   :  { %568 = vadd.xlane.f32.xlu1 %v563_v13  ;;  %v553_v17 = vsel %vm532_vm11, %v529_v54, %v549_v15 }
 0x353   :  { %564 = vadd.xlane.f32.xlu0 %v561_v16  ;;  %v562_v18 = vmul.f32 %v560_v7, %v553_v17 }
 0x357   :  { %566 = vadd.xlane.f32.xlu0 %v562_v18 }
 0x3df   :  { %v569_v20 = vpop.xlane.xlu1 %568 }
 0x3e0   :  { %v574_v21 = vadd.f32 %v571_v19, %v569_v20  ;;  %v565_v22 = vpop.xlane.xlu0 %564 }
 0x3e1   :  { %v572_v23 = vadd.f32 %v571_v19, %v565_v22 }
 0x3e2   :  { %578 = vst.msk [vmem:[%s1095_s12 + $0x10] sm:$0xff] %vm575_vm12, %v574_v21 }
 0x3e3   :  { %576 = vst.msk [vmem:[%s1095_s12] sm:$0xff] %vm575_vm12, %v572_v23 }
 0x3e4   :  { %v567_v24 = vpop.xlane.xlu0 %566 }
 0x3e5   :  { %v573_v25 = vadd.f32 %v571_v19, %v567_v24 }
 0x3e7   :  { %577 = vst.msk [vmem:[%s1095_s12 + $0x8] sm:$0xff] %vm575_vm12, %v573_v25 }
 0x3e8   :  { %583 = vsyncpa [#allocation4], 1 }
 0x3e9   :  { %584 = vsyncpa [#allocation6], 1 }
 0x3ea   :  { %585 = vsyncpa [#allocation9], 1 }

</bundles_post_ra>
